<compile_context>
chip_gen: v5e
topology: v5e:2x2
jax: 0.10.0
libtpu: 0.0.40
codegen_flags: <defaults>
</compile_context>

<pallas_src>
import functools

import jax
import jax.numpy as jnp
from jax.experimental import pallas as pl
from jax.experimental.pallas import tpu as pltpu


def _round_up(x, m):
    return (x + m - 1) // m * m


def _choose_tile_b(batch, tile_b):
    tile_b = max(256, _round_up(tile_b, 256))
    if batch <= 256:
        return _round_up(batch, 8)            # single tile; lane dim == full dim
    n_tiles = max(2, -(-batch // tile_b))     # >= 2 grid steps so v7x uses both TCs
    return min(tile_b, _round_up(-(-batch // n_tiles), 256))


# --------------------------------------------------------------------------- kernel
def pnn_kernel(act_ref,                        # [W1p, tb]   (dense | multi-hot).T
               w_all_ref, bias_ref,            # [Ntot, W1p], [Ntot, 1]
               exp_lr_ref, w2nd_ref,           # [2*EEp, Ep], [Hp, Fp+EEp]
               w2_ref, b2_ref, wo_ref, bo_ref,  # MLP head (transposed, padded)
               out_ref):                       # [8, tb]  (lane-dense, row-replicated)
    dot = lambda a, b: jnp.dot(a, b, preferred_element_type=jnp.float32)

    Hp = w2nd_ref.shape[0]
    EEp = exp_lr_ref.shape[0] // 2
    Ep = exp_lr_ref.shape[1]
    Fp = w2nd_ref.shape[1] - EEp

    # One matmul producing (batch on lanes):
    #   rows [0:Hp)            linear z-path, hidden-layer-1 weights pre-applied (+b1)
    #   rows [Hp:Hp+Fp)        per-feature embedding row sums
    #   rows [Hp+Fp:Hp+Fp+Ep)  per-embed-dim sums over features
    c = dot(w_all_ref[...], act_ref[...]) + bias_ref[...]              # [Ntot, tb]
    h1_lin = c[:Hp]
    row_sum = c[Hp:Hp + Fp]
    z_sum = c[Hp + Fp:Hp + Fp + Ep]

    # Outer-product expansion: ze[:EEp]*ze[EEp:] == z_sum[i]*z_sum[j] per (i,j).
    ze = dot(exp_lr_ref[...], z_sum)                                    # [2*EEp, tb]
    res_outer = ze[:EEp] * ze[EEp:]                                     # [EEp, tb]

    # Fused inner+outer product contribution to hidden layer 1 (single matmul).
    lhs2 = jnp.concatenate([row_sum * row_sum, res_outer], axis=0)      # [Fp+EEp, tb]
    h1 = jnp.maximum(h1_lin + dot(w2nd_ref[...], lhs2), 0.0)            # [Hp, tb]

    h2 = jnp.maximum(dot(w2_ref[...], h1) + b2_ref[...], 0.0)           # [H2p, tb]

    # Final Linear(H2 -> 1): VPU multiply + sublane reduce; stored lane-dense.
    o = jnp.sum(h2 * wo_ref[...], axis=0, keepdims=True) + bo_ref[...]  # [1, tb]
    out_ref[...] = jnp.broadcast_to(o, out_ref.shape)


# --------------------------------------------------------------------------- wrapper
def pnn_forward(dense_x, discrete_x, params, *, embed_dim, interact_feature_nums,
                is_interact, tile_b=4096, mxu_dtype=jnp.float32):
    # TODO(synk): only the default is_inner=True / is_outer=True path is implemented.
    f32 = jnp.float32
    B, D = dense_x.shape
    E = embed_dim

    if (not is_interact) and interact_feature_nums > 0:
        discrete_x = discrete_x[:, :-interact_feature_nums]

    emb_tables = params["emb"]
    F_disc = len(emb_tables)
    F = F_disc + 1
    sizes = [int(t.shape[0]) for t in emb_tables]
    V = sum(sizes)
    offsets = [0]
    for s in sizes[:-1]:
        offsets.append(offsets[-1] + s)

    U = params["wz"].shape[0]
    H = params["w1"].shape[0]
    H2 = params["w2"].shape[0]
    EE = E * E

    # 8-sublane aligned group sizes (slices in-kernel stay vreg-aligned).
    Hp, Fp, Ep = _round_up(H, 8), _round_up(F, 8), _round_up(E, 8)
    EEp, H2p = _round_up(EE, 8), _round_up(H2, 8)
    W1 = D + V
    W1p = _round_up(W1, 8)
    Ntot = Hp + Fp + Ep

    pad_c = lambda x, n: jnp.pad(x, ((0, 0), (0, n - x.shape[1])))
    pad_rc = lambda x, r, c: jnp.pad(x, ((0, r - x.shape[0]), (0, c - x.shape[1])))

    # ---- weight folding (once per call under jit; independent of batch) ------
    # flat_z = [dense_x | multi-hot] @ M + b_flatz
    emb_block = jnp.concatenate(
        [jnp.pad(t.astype(f32), ((0, 0), (i * E, (F_disc - 1 - i) * E)))
         for i, t in enumerate(emb_tables)], axis=0)                     # [V, F_disc*E]
    M_top = jnp.concatenate([jnp.zeros((D, F_disc * E), f32),
                             params["dense_w"].T.astype(f32)], axis=1)   # [D, F*E]
    M_bot = jnp.concatenate([emb_block, jnp.zeros((V, E), f32)], axis=1)  # [V, F*E]
    M = jnp.concatenate([M_top, M_bot], axis=0)                          # [W1, F*E]
    b_flatz = jnp.concatenate([jnp.zeros((F_disc * E,), f32),
                               params["dense_b"].astype(f32)])

    # hidden_layer_1 split along its input axis: feat = [out1 | out2 | out3]
    w1_T = params["w1"].T.astype(f32)                                    # [3U, H]
    w1a, w1b, w1c = w1_T[:U], w1_T[U:2 * U], w1_T[2 * U:3 * U]
    wz1 = params["wz"].T.astype(f32) @ w1a                               # [F*E, H]
    sel_row = jnp.repeat(jnp.eye(F, dtype=f32), E, axis=0)               # [F*E, F]
    sel_col = jnp.tile(jnp.eye(E, dtype=f32), (F, 1))                    # [F*E, E]
    w_flat = jnp.concatenate([pad_c(wz1, Hp), pad_c(sel_row, Fp),
                              pad_c(sel_col, Ep)], axis=1)               # [F*E, Ntot]
    b_grp = jnp.concatenate([jnp.pad(params["b1"].astype(f32), (0, Hp - H)),
                             jnp.zeros((Fp + Ep,), f32)])                # [Ntot]

    W_all = M @ w_flat                                                   # [W1, Ntot]
    bias_all = b_flatz @ w_flat + b_grp                                  # [Ntot]
    W_allT = jnp.pad(W_all, ((0, W1p - W1), (0, 0))).T.astype(mxu_dtype)  # [Ntot, W1p]
    bias_col = bias_all[:, None]                                         # [Ntot, 1]

    # inner + outer product weights, folded into hidden layer 1 and fused.
    wip1T = w1b.T @ (params["wip"].astype(f32) ** 2)                     # [H, F]
    wop1T = w1c.T @ params["wop"].astype(f32).T                          # [H, EE]
    W2nd = jnp.concatenate([pad_rc(wip1T, Hp, Fp),
                            pad_rc(wop1T, Hp, EEp)], axis=1)             # [Hp, Fp+EEp]

    exp_lT = jnp.repeat(jnp.eye(E, dtype=f32), E, axis=0)                # [EE, E]
    exp_rT = jnp.tile(jnp.eye(E, dtype=f32), (E, 1))                     # [EE, E]
    exp_lrT = jnp.concatenate([pad_rc(exp_lT, EEp, Ep),
                               pad_rc(exp_rT, EEp, Ep)], axis=0)         # [2*EEp, Ep]

    w2p = pad_rc(params["w2"].astype(f32), H2p, Hp)                      # [H2p, Hp]
    b2c = jnp.pad(params["b2"].astype(f32), (0, H2p - H2))[:, None]      # [H2p, 1]
    woc = jnp.pad(params["wo"].astype(f32)[0], (0, H2p - H2))[:, None]   # [H2p, 1]
    boc = params["bo"].astype(f32).reshape(1, 1)                         # [1, 1]

    # ---- single streamed activation (transposed; built padded directly) ------
    tb = _choose_tile_b(B, tile_b)
    Bp = _round_up(B, tb)
    grid = Bp // tb

    dense_p = jnp.pad(dense_x.astype(f32), ((0, Bp - B), (0, 0)))        # [Bp, D]
    gidx = discrete_x.astype(jnp.int32) + jnp.asarray(offsets, jnp.int32)[None, :]
    gidx_p = jnp.pad(gidx, ((0, Bp - B), (0, 0)))                        # [Bp, F_disc]
    mh_T = jax.nn.one_hot(gidx_p, V, dtype=f32, axis=0).sum(axis=2)      # [V, Bp]
    act_T = jnp.concatenate(
        [dense_p.T, mh_T, jnp.zeros((W1p - W1, Bp), f32)],
        axis=0).astype(mxu_dtype)                                        # [W1p, Bp]

    def resident(a):  # whole-array block, constant index_map -> stays VMEM-resident
        nd = a.ndim
        return pl.BlockSpec(a.shape, lambda i, nd=nd: (0,) * nd)

    out = pl.pallas_call(
        pnn_kernel,
        out_shape=jax.ShapeDtypeStruct((8, Bp), jnp.float32),
        grid=(grid,),
        in_specs=[
            pl.BlockSpec((W1p, tb), lambda i: (0, i)),                   # activation
            resident(W_allT), resident(bias_col),
            resident(exp_lrT), resident(W2nd),
            resident(w2p), resident(b2c), resident(woc), resident(boc),
        ],
        out_specs=pl.BlockSpec((8, tb), lambda i: (0, i)),
        compiler_params=pltpu.CompilerParams(
            dimension_semantics=("parallel",),       # batch axis shards over v7x's 2 TCs
            vmem_limit_bytes=32 * 1024 * 1024),
    )(act_T, W_allT, bias_col, exp_lrT, W2nd, w2p, b2c, woc, boc)

    return out[0, :B][:, None]


# --------------------------------------------------------------------------- reference
def pnn_reference(dense_x, discrete_x, params, *, embed_dim, interact_feature_nums,
                  is_interact):
    B = dense_x.shape[0]
    dense_embed = dense_x @ params["dense_w"].T + params["dense_b"]
    if (not is_interact) and interact_feature_nums > 0:
        discrete_x = discrete_x[:, :-interact_feature_nums]
    disc_embeds = jnp.stack(
        [params["emb"][i][discrete_x[:, i]] for i in range(len(params["emb"]))], axis=1)
    z = jnp.concatenate([disc_embeds, dense_embed[:, None, :]], axis=1)
    flat_z = z.reshape(B, -1)
    out1 = flat_z @ params["wz"].T
    res_inner = jnp.einsum("bij,ki->bkij", z, params["wip"])
    res_inner_sum = res_inner.sum(-1)
    out2 = (res_inner_sum ** 2).sum(-1)
    z_sum = z.sum(1)
    res_outer = jnp.einsum("bi,bj->bij", z_sum, z_sum).reshape(B, -1)
    out3 = res_outer @ params["wop"]
    out = jnp.concatenate([out1, out2, out3], axis=1)
    out = jax.nn.relu(out @ params["w1"].T + params["b1"])
    out = jax.nn.relu(out @ params["w2"].T + params["b2"])
    return out @ params["wo"].T + params["bo"]


# --------------------------------------------------------------------------- params
def init_params(key, feature_dims, dense_dims, embed_dim, units, hidden_size,
                interact_feature_nums, is_interact):
    embed_nums = feature_dims if is_interact else feature_dims[:-interact_feature_nums]
    num_features = len(embed_nums) + 1

    def xavier(k, shape):  # (fan_out, fan_in)
        bound = (6.0 / (shape[0] + shape[1])) ** 0.5
        return jax.random.uniform(k, shape, jnp.float32, -bound, bound)

    def lin(k, shape):     # PyTorch-ish default Linear init
        bound = 1.0 / (shape[1] ** 0.5)
        return jax.random.uniform(k, shape, jnp.float32, -bound, bound)

    keys = jax.random.split(key, 12 + len(embed_nums))
    p = {}
    p["dense_w"] = xavier(keys[0], (embed_dim, dense_dims))
    p["dense_b"] = jax.random.uniform(keys[1], (embed_dim,), jnp.float32, -0.1, 0.1)
    p["emb"] = [xavier(keys[2 + i], (dim, embed_dim)) for i, dim in enumerate(embed_nums)]
    o = 2 + len(embed_nums)
    p["wz"] = lin(keys[o + 0], (units, num_features * embed_dim))
    p["wip"] = jax.random.normal(keys[o + 1], (units, num_features), jnp.float32)
    p["wop"] = jax.random.normal(keys[o + 2], (embed_dim ** 2, units), jnp.float32)
    p["w1"] = lin(keys[o + 3], (hidden_size, units * 3))
    p["b1"] = jax.random.uniform(keys[o + 4], (hidden_size,), jnp.float32, -0.1, 0.1)
    p["w2"] = lin(keys[o + 5], (hidden_size // 2, hidden_size))
    p["b2"] = jax.random.uniform(keys[o + 6], (hidden_size // 2,), jnp.float32, -0.1, 0.1)
    p["wo"] = lin(keys[o + 7], (1, hidden_size // 2))
    p["bo"] = jax.random.uniform(keys[o + 8], (1,), jnp.float32, -0.1, 0.1)
    return p


# --------------------------------------------------------------------------- main
if __name__ == "__main__":
    key = jax.random.PRNGKey(0)
    feature_dims = [11, 13, 17, 19]
    dense_feature_dims = 16
    embed_dim = 8
    hidden_size = 32
    units = 16
    interact_feature_nums = 1
    is_interact = False
    B = 8

    k_param, k_dense, k_disc = jax.random.split(key, 3)
    params = init_params(k_param, feature_dims, dense_feature_dims, embed_dim,
                         units, hidden_size, interact_feature_nums, is_interact)

    dense_x = jax.random.normal(k_dense, (B, dense_feature_dims), jnp.float32)
    disc_keys = jax.random.split(k_disc, len(feature_dims))
    discrete_x = jnp.stack(
        [jax.random.randint(disc_keys[i], (B,), 0, feature_dims[i])
         for i in range(len(feature_dims))], axis=1).astype(jnp.int32)

    run = jax.jit(functools.partial(
        pnn_forward, embed_dim=embed_dim,
        interact_feature_nums=interact_feature_nums,
        is_interact=is_interact, tile_b=4096))
    out = jax.block_until_ready(run(dense_x, discrete_x, params))

    ref = pnn_reference(dense_x, discrete_x, params, embed_dim=embed_dim,
                        interact_feature_nums=interact_feature_nums,
                        is_interact=is_interact)
    assert out.shape == (B, 1), out.shape
    max_err = float(jnp.max(jnp.abs(out - ref)))
    assert max_err < 5e-2, f"kernel/reference mismatch: max_abs_err={max_err}"
    print("KERNEL_OK")
</pallas_src>

<mosaic_0001>
module attributes {stable_mosaic.version = 11 : i64} {
  func.func @pnn_kernel(%arg0: i32, %arg1: memref<64x8xf32, #tpu.memory_space<vmem>>, %arg2: memref<48x64xf32, #tpu.memory_space<vmem>>, %arg3: memref<48x1xf32, #tpu.memory_space<vmem>>, %arg4: memref<128x8xf32, #tpu.memory_space<vmem>>, %arg5: memref<32x72xf32, #tpu.memory_space<vmem>>, %arg6: memref<16x32xf32, #tpu.memory_space<vmem>>, %arg7: memref<16x1xf32, #tpu.memory_space<vmem>>, %arg8: memref<16x1xf32, #tpu.memory_space<vmem>>, %arg9: memref<1x1xf32, #tpu.memory_space<vmem>>, %arg10: memref<8x8xf32, #tpu.memory_space<vmem>>) attributes {dimension_semantics = [#tpu.dimension_semantics<parallel>], iteration_bounds = array<i64: 1>, scalar_prefetch = 0 : i64, scratch_operands = 0 : i64, tpu.core_type = #tpu.core_type<tc>, window_params = [{transform_indices = @transform_0, window_bounds = array<i64: 64, 8>}, {pipeline_mode = #tpu.pipeline_mode<synchronous>, transform_indices = @transform_1, window_bounds = array<i64: 48, 64>}, {pipeline_mode = #tpu.pipeline_mode<synchronous>, transform_indices = @transform_2, window_bounds = array<i64: 48, 1>}, {pipeline_mode = #tpu.pipeline_mode<synchronous>, transform_indices = @transform_3, window_bounds = array<i64: 128, 8>}, {pipeline_mode = #tpu.pipeline_mode<synchronous>, transform_indices = @transform_4, window_bounds = array<i64: 32, 72>}, {pipeline_mode = #tpu.pipeline_mode<synchronous>, transform_indices = @transform_5, window_bounds = array<i64: 16, 32>}, {pipeline_mode = #tpu.pipeline_mode<synchronous>, transform_indices = @transform_6, window_bounds = array<i64: 16, 1>}, {pipeline_mode = #tpu.pipeline_mode<synchronous>, transform_indices = @transform_7, window_bounds = array<i64: 16, 1>}, {pipeline_mode = #tpu.pipeline_mode<synchronous>, transform_indices = @transform_8, window_bounds = array<i64: 1, 1>}, {transform_indices = @transform_9, window_bounds = array<i64: 8, 8>}]} {
    %c0 = arith.constant 0 : index
    %c0_0 = arith.constant 0 : index
    %0 = vector.load %arg2[%c0, %c0_0] : memref<48x64xf32, #tpu.memory_space<vmem>>, vector<48x64xf32>
    %c0_1 = arith.constant 0 : index
    %c0_2 = arith.constant 0 : index
    %1 = vector.load %arg1[%c0_1, %c0_2] : memref<64x8xf32, #tpu.memory_space<vmem>>, vector<64x8xf32>
    %cst = arith.constant dense<0.000000e+00> : vector<48x8xf32>
    %2 = tpu.matmul %0, %1, %cst {dimension_numbers = #tpu.dot_dimension_numbers<[1], [0], [0], [1], [0, 0, 1, 1], [], []>} : vector<48x64xf32>, vector<64x8xf32>, vector<48x8xf32> -> vector<48x8xf32>
    %c0_3 = arith.constant 0 : index
    %c0_4 = arith.constant 0 : index
    %3 = vector.load %arg3[%c0_3, %c0_4] : memref<48x1xf32, #tpu.memory_space<vmem>>, vector<48x1xf32>
    %4 = vector.broadcast %3 : vector<48x1xf32> to vector<48x8xf32>
    %5 = arith.addf %2, %4 : vector<48x8xf32>
    %6 = vector.extract_strided_slice %5 {offsets = [0, 0], sizes = [32, 8], strides = [1, 1]} : vector<48x8xf32> to vector<32x8xf32>
    %7 = vector.extract_strided_slice %5 {offsets = [32, 0], sizes = [8, 8], strides = [1, 1]} : vector<48x8xf32> to vector<8x8xf32>
    %8 = vector.extract_strided_slice %5 {offsets = [40, 0], sizes = [8, 8], strides = [1, 1]} : vector<48x8xf32> to vector<8x8xf32>
    %c0_5 = arith.constant 0 : index
    %c0_6 = arith.constant 0 : index
    %9 = vector.load %arg4[%c0_5, %c0_6] : memref<128x8xf32, #tpu.memory_space<vmem>>, vector<128x8xf32>
    %cst_7 = arith.constant dense<0.000000e+00> : vector<128x8xf32>
    %10 = tpu.matmul %9, %8, %cst_7 {dimension_numbers = #tpu.dot_dimension_numbers<[1], [0], [0], [1], [0, 0, 1, 1], [], []>} : vector<128x8xf32>, vector<8x8xf32>, vector<128x8xf32> -> vector<128x8xf32>
    %11 = vector.extract_strided_slice %10 {offsets = [0, 0], sizes = [64, 8], strides = [1, 1]} : vector<128x8xf32> to vector<64x8xf32>
    %12 = vector.extract_strided_slice %10 {offsets = [64, 0], sizes = [64, 8], strides = [1, 1]} : vector<128x8xf32> to vector<64x8xf32>
    %13 = arith.mulf %11, %12 : vector<64x8xf32>
    %14 = arith.mulf %7, %7 : vector<8x8xf32>
    %15 = tpu.concatenate %14, %13 in 0 : vector<8x8xf32>, vector<64x8xf32> -> vector<72x8xf32>
    %c0_8 = arith.constant 0 : index
    %c0_9 = arith.constant 0 : index
    %16 = vector.load %arg5[%c0_8, %c0_9] : memref<32x72xf32, #tpu.memory_space<vmem>>, vector<32x72xf32>
    %cst_10 = arith.constant dense<0.000000e+00> : vector<32x8xf32>
    %17 = tpu.matmul %16, %15, %cst_10 {dimension_numbers = #tpu.dot_dimension_numbers<[1], [0], [0], [1], [0, 0, 1, 1], [], []>} : vector<32x72xf32>, vector<72x8xf32>, vector<32x8xf32> -> vector<32x8xf32>
    %18 = arith.addf %6, %17 : vector<32x8xf32>
    %cst_11 = arith.constant 0.000000e+00 : f32
    %19 = vector.broadcast %cst_11 : f32 to vector<32x8xf32>
    %20 = arith.maximumf %18, %19 : vector<32x8xf32>
    %c0_12 = arith.constant 0 : index
    %c0_13 = arith.constant 0 : index
    %21 = vector.load %arg6[%c0_12, %c0_13] : memref<16x32xf32, #tpu.memory_space<vmem>>, vector<16x32xf32>
    %cst_14 = arith.constant dense<0.000000e+00> : vector<16x8xf32>
    %22 = tpu.matmul %21, %20, %cst_14 {dimension_numbers = #tpu.dot_dimension_numbers<[1], [0], [0], [1], [0, 0, 1, 1], [], []>} : vector<16x32xf32>, vector<32x8xf32>, vector<16x8xf32> -> vector<16x8xf32>
    %c0_15 = arith.constant 0 : index
    %c0_16 = arith.constant 0 : index
    %23 = vector.load %arg7[%c0_15, %c0_16] : memref<16x1xf32, #tpu.memory_space<vmem>>, vector<16x1xf32>
    %24 = vector.broadcast %23 : vector<16x1xf32> to vector<16x8xf32>
    %25 = arith.addf %22, %24 : vector<16x8xf32>
    %cst_17 = arith.constant 0.000000e+00 : f32
    %26 = vector.broadcast %cst_17 : f32 to vector<16x8xf32>
    %27 = arith.maximumf %25, %26 : vector<16x8xf32>
    %c0_18 = arith.constant 0 : index
    %c0_19 = arith.constant 0 : index
    %28 = vector.load %arg8[%c0_18, %c0_19] : memref<16x1xf32, #tpu.memory_space<vmem>>, vector<16x1xf32>
    %29 = vector.broadcast %28 : vector<16x1xf32> to vector<16x8xf32>
    %30 = arith.mulf %27, %29 : vector<16x8xf32>
    %cst_20 = arith.constant dense<0.000000e+00> : vector<8xf32>
    %31 = vector.multi_reduction <add>, %30, %cst_20 [0] : vector<16x8xf32> to vector<8xf32>
    %32 = vector.shape_cast %31 : vector<8xf32> to vector<1x8xf32>
    %c0_21 = arith.constant 0 : index
    %c0_22 = arith.constant 0 : index
    %33 = vector.load %arg9[%c0_21, %c0_22] : memref<1x1xf32, #tpu.memory_space<vmem>>, vector<1x1xf32>
    %34 = vector.broadcast %33 : vector<1x1xf32> to vector<1x8xf32>
    %35 = arith.addf %32, %34 : vector<1x8xf32>
    %36 = vector.shape_cast %35 : vector<1x8xf32> to vector<1x8xf32>
    %37 = vector.broadcast %36 : vector<1x8xf32> to vector<8x8xf32>
    %c0_23 = arith.constant 0 : index
    %c0_24 = arith.constant 0 : index
    %38 = vector.load %arg10[%c0_23, %c0_24] : memref<8x8xf32, #tpu.memory_space<vmem>>, vector<8x8xf32>
    tpu.vector_store %arg10[%c0_23, %c0_24], %37 {strides = array<i32>} : memref<8x8xf32, #tpu.memory_space<vmem>>, vector<8x8xf32>,
    return
  }
  func.func @transform_0(%arg0: i32) -> (i32, i32) {
    %c0_i32 = arith.constant 0 : i32
    %c0_i32_0 = arith.constant 0 : i32
    return %c0_i32, %arg0 : i32, i32
  }
  func.func @transform_1(%arg0: i32) -> (i32, i32) {
    %c0_i32 = arith.constant 0 : i32
    %c0_i32_0 = arith.constant 0 : i32
    %c0_i32_1 = arith.constant 0 : i32
    return %c0_i32, %c0_i32_0 : i32, i32
  }
  func.func @transform_2(%arg0: i32) -> (i32, i32) {
    %c0_i32 = arith.constant 0 : i32
    %c0_i32_0 = arith.constant 0 : i32
    %c0_i32_1 = arith.constant 0 : i32
    return %c0_i32, %c0_i32_0 : i32, i32
  }
  func.func @transform_3(%arg0: i32) -> (i32, i32) {
    %c0_i32 = arith.constant 0 : i32
    %c0_i32_0 = arith.constant 0 : i32
    %c0_i32_1 = arith.constant 0 : i32
    return %c0_i32, %c0_i32_0 : i32, i32
  }
  func.func @transform_4(%arg0: i32) -> (i32, i32) {
    %c0_i32 = arith.constant 0 : i32
    %c0_i32_0 = arith.constant 0 : i32
    %c0_i32_1 = arith.constant 0 : i32
    return %c0_i32, %c0_i32_0 : i32, i32
  }
  func.func @transform_5(%arg0: i32) -> (i32, i32) {
    %c0_i32 = arith.constant 0 : i32
    %c0_i32_0 = arith.constant 0 : i32
    %c0_i32_1 = arith.constant 0 : i32
    return %c0_i32, %c0_i32_0 : i32, i32
  }
  func.func @transform_6(%arg0: i32) -> (i32, i32) {
    %c0_i32 = arith.constant 0 : i32
    %c0_i32_0 = arith.constant 0 : i32
    %c0_i32_1 = arith.constant 0 : i32
    return %c0_i32, %c0_i32_0 : i32, i32
  }
  func.func @transform_7(%arg0: i32) -> (i32, i32) {
    %c0_i32 = arith.constant 0 : i32
    %c0_i32_0 = arith.constant 0 : i32
    %c0_i32_1 = arith.constant 0 : i32
    return %c0_i32, %c0_i32_0 : i32, i32
  }
  func.func @transform_8(%arg0: i32) -> (i32, i32) {
    %c0_i32 = arith.constant 0 : i32
    %c0_i32_0 = arith.constant 0 : i32
    %c0_i32_1 = arith.constant 0 : i32
    return %c0_i32, %c0_i32_0 : i32, i32
  }
  func.func @transform_9(%arg0: i32) -> (i32, i32) {
    %c0_i32 = arith.constant 0 : i32
    %c0_i32_0 = arith.constant 0 : i32
    return %c0_i32, %arg0 : i32, i32
  }
}

</mosaic_0001>

<bundles_post_ra>
// kernel: tile.19
= control target key start
LH: loop header
LB: loop body
LE: loop exit
PB: predicated region body
PF: predicated region fallthrough
CT: control target
= control target key end

     0   :  { %vm4_vm0 = vcmask 1047556   ;;  %s99_s14 = smov 56   ;;  %s100_s15 = smov 40   ;;  %vm6_vm1 = vcmask 64512   ;;  %vm16_vm2 = vcmask 523712   ;;  %vm26_vm3 = vcmask 458112   ;;  %s196_s0 = inlined_call_operand.vmem [shape: f32[8,8,8], index: 0, kind: input, shape index: {}]   ;;  %s197_s1 = inlined_call_operand.vmem [shape: f32[64,8], index: 1, kind: output, shape index: {}]  }
   0x1   :  { %v78_v0 = vld [vmem:[%s196_s0 + $0x7] ss:$8 sm:$0xf]   ;;  %v82_v3 = vld [vmem:[%s196_s0 + $0x5] ss:$8 sm:$0xf]  }
   0x2   :  { %v79_v1 = vld [vmem:[%s196_s0 + $0x7] ss:$8 sm:$0xf0]   ;;  %v83_v4 = vld [vmem:[%s196_s0 + $0x5] ss:$8 sm:$0xf0]  }
   0x3   :  { %v13_v2 = vsel %vm4_vm0, %v79_v1, %v78_v0  ;;  %v33_v5 = vsel %vm4_vm0, %v83_v4, %v82_v3  ;;  %v80_v6 = vld [vmem:[%s196_s0 + $0x6] ss:$8 sm:$0xf]   ;;  %v84_v8 = vld [vmem:[%s196_s0 + $0x4] ss:$8 sm:$0xf]  }
   0x4   :  { %14 = vrot.lane.b32.xlu0 %v13_v2, %s99_s14  ;;  %34 = vrot.lane.b32.xlu1 %v33_v5, %s100_s15  ;;  %v81_v7 = vld [vmem:[%s196_s0 + $0x6] ss:$8 sm:$0xf0]   ;;  %v85_v9 = vld [vmem:[%s196_s0 + $0x4] ss:$8 sm:$0xf0]  }
   0x5   :  { %v86_v10 = vld [vmem:[%s196_s0 + $0x3] ss:$8 sm:$0xf]   ;;  %v23_v12 = vsel %vm4_vm0, %v81_v7, %v80_v6  ;;  %v43_v14 = vsel %vm4_vm0, %v85_v9, %v84_v8  ;;  %s101_s28 = smov 24   ;;  %s102_s29 = smov 48   ;;  %vm36_vm4 = vcmask 392512  }
   0x6   :  { %v87_v11 = vld [vmem:[%s196_s0 + $0x3] ss:$8 sm:$0xf0]   ;;  %v88_v15 = vld [vmem:[%s196_s0 + $0x2] ss:$8 sm:$0xf]  }
   0x7   :  { %v53_v13 = vsel %vm4_vm0, %v87_v11, %v86_v10  ;;  %v89_v16 = vld [vmem:[%s196_s0 + $0x2] ss:$8 sm:$0xf0]   ;;  %s103_s5 = smov 32   ;;  %s104_s10 = smov 16   ;;  %vm46_vm5 = vcmask 326912  }
   0x8   :  { %54 = vrot.lane.b32.xlu2 %v53_v13, %s101_s28  ;;  %v90_v17 = vld [vmem:[%s196_s0 + $0x1] ss:$8 sm:$0xf]   ;;  %v63_v19 = vsel %vm4_vm0, %v89_v16, %v88_v15  ;;  %s105_s11 = smov 8   ;;  %vm56_vm6 = vcmask 261312   ;;  %vm66_vm7 = vcmask 195712  }
   0x9   :  { %v91_v18 = vld [vmem:[%s196_s0 + $0x1] ss:$8 sm:$0xf0]   ;;  %v2_v21 = vld [vmem:[%s196_s0] ss:$8 sm:$0xf]  }
   0xa   :  { %v73_v20 = vsel %vm4_vm0, %v91_v18, %v90_v17  ;;  %v3_v22 = vld [vmem:[%s196_s0] ss:$8 sm:$0xf0]   ;;  %vm76_vm8 = vcmask 130112  }
   0xb   :  { %v5_v23 = vsel %vm4_vm0, %v3_v22, %v2_v21 }
   0xc   :  { %24 = vrot.lane.b32.xlu0 %v23_v12, %s102_s29  ;;  %44 = vrot.lane.b32.xlu1 %v43_v14, %s103_s5  ;;  %7 = vst.msk [vmem:[%s197_s1] sm:$0xff] %vm6_vm1, %v5_v23  }
  0x10   :  { %64 = vrot.lane.b32.xlu2 %v63_v19, %s104_s10 }
  0x14   :  { %74 = vrot.lane.b32.xlu0 %v73_v20, %s105_s11 }
  0x62   :  { %v55_v24 = vpop.permute.xlu2 %54  }
  0x6a   :  { %v65_v25 = vpop.permute.xlu2 %64  }
  0x76   :  { %v15_v26 = vpop.permute.xlu0 %14   ;;  %v35_v27 = vpop.permute.xlu1 %34  }
  0x77   :  { %17 = vst.msk [vmem:[%s197_s1] sm:$0xff] %vm16_vm2, %v15_v26  }
  0x7e   :  { %v25_v28 = vpop.permute.xlu0 %24   ;;  %v45_v29 = vpop.permute.xlu1 %44  }
  0x7f   :  { %27 = vst.msk [vmem:[%s197_s1] sm:$0xff] %vm26_vm3, %v25_v28  }
  0x80   :  { %37 = vst.msk [vmem:[%s197_s1] sm:$0xff] %vm36_vm4, %v35_v27  }
  0x81   :  { %47 = vst.msk [vmem:[%s197_s1] sm:$0xff] %vm46_vm5, %v45_v29  }
  0x82   :  { %57 = vst.msk [vmem:[%s197_s1] sm:$0xff] %vm56_vm6, %v55_v24  }
  0x83   :  { %67 = vst.msk [vmem:[%s197_s1] sm:$0xff] %vm66_vm7, %v65_v25  }
  0x86   :  { %v75_v30 = vpop.permute.xlu0 %74  }
  0x87   :  { %77 = vst.msk [vmem:[%s197_s1] sm:$0xff] %vm76_vm8, %v75_v30  }

// kernel: pnn_forward.1
= control target key start
LH: loop header
LB: loop body
LE: loop exit
PB: predicated region body
PF: predicated region fallthrough
CT: control target
= control target key end

     0   :  { %v447_v2 = vmov 0   ;;  %vm84_vm0 = vcmask 523264   ;;  %vm154_vm1 = vcmask 64512   ;;  %vm281_vm2 = vcmask 588800   ;;  %s682_s0 = inlined_call_operand.vmem [shape: f32[64,8], index: 0, kind: input, shape index: {}]   ;;  %s683_s2 = inlined_call_operand.vmem [shape: f32[48,1], index: 2, kind: input, shape index: {}]   ;;  %s684_s1 = inlined_call_operand.vmem [shape: f32[48,64], index: 1, kind: input, shape index: {}]   ;;  %s685_s6 = inlined_call_operand.vmem [shape: f32[16,1], index: 6, kind: input, shape index: {}]   ;;  %s686_s7 = inlined_call_operand.vmem [shape: f32[16,1], index: 7, kind: input, shape index: {}]   ;;  %s687_s3 = inlined_call_operand.vmem [shape: f32[128,8], index: 3, kind: input, shape index: {}]   ;;  %s688_s8 = inlined_call_operand.<no memory space> [shape: f32[1,1], index: 8, kind: input, shape index: {}]   ;;  %s689_s4 = inlined_call_operand.vmem [shape: f32[32,72], index: 4, kind: input, shape index: {}]   ;;  %s690_s5 = inlined_call_operand.vmem [shape: f32[16,32], index: 5, kind: input, shape index: {}]   ;;  %s691_s9 = inlined_call_operand.vmem [shape: f32[8,8], index: 9, kind: output, shape index: {}]  }
   0x1   :  { %v47_v0 = vld [vmem:[%s682_s0 + $0x38] sm:$0xff]  ;;  %v46_v1 = vld [vmem:[%s682_s0 + $0x30] sm:$0xff]  ;;  %445 = vset.pattern.permute.xlu1 %v447_v2  ;;  %v45_v3 = vld [vmem:[%s682_s0 + $0x28] sm:$0xff]  ;;  %446 = vset.pattern.permute.xlu2 %v447_v2  ;;  %vm345_vm3 = vcmask 261120  }
   0x2   :  { %111 = vmatpush.msra.mxu0 %v47_v0  ;;  %444 = vset.pattern.permute.xlu0 %v447_v2  ;;  %v51_v4 = vld [vmem:[%s683_s2 + $0x18] sm:$0xff]  ;;  %v44_v5 = vld [vmem:[%s682_s0 + $0x20] sm:$0xff]  ;;  %v42_v7 = vld [vmem:[%s682_s0 + $0x10] sm:$0xff] }
   0x3   :  { %71 = vperm.xlu1 %445, %v51_v4   ;;  %v43_v6 = vld [vmem:[%s682_s0 + $0x18] sm:$0xff]  ;;  %v53_v8 = vld [vmem:[%s683_s2 + $0x28] sm:$0xff]  ;;  %v50_v10 = vld [vmem:[%s683_s2 + $0x10] sm:$0xff] }
   0x4   :  { %112 = vmatpush.msra.mxu0 %v46_v1  ;;  %v49_v9 = vld [vmem:[%s683_s2 + $0x8] sm:$0xff]  ;;  %81 = vperm.xlu0 %444, %v53_v8   ;;  %v40_v12 = vld [vmem:[%s682_s0] sm:$0xff]  ;;  %v36_v18 = vld [vmem:[%s684_s1 + $0x10] sm:$0xff] }
   0x5   :  { %v41_v11 = vld [vmem:[%s682_s0 + $0x8] sm:$0xff]  ;;  %61 = vperm.xlu2 %446, %v49_v9   ;;  %v34_v13 = vld [vmem:[%s684_s1] sm:$0xff]  ;;  %v37_v20 = vld [vmem:[%s684_s1 + $0x18] sm:$0xff] }
   0x6   :  { %113 = vmatpush.msra.mxu0 %v45_v3  ;;  %v52_v14 = vld [vmem:[%s683_s2 + $0x20] sm:$0xff]  ;;  %v35_v16 = vld [vmem:[%s684_s1 + $0x8] sm:$0xff]  ;;  %v148_v33 = vld [vmem:[%s687_s3 + $0x50] sm:$0xff] }
   0x7   :  { %v48_v15 = vld [vmem:[%s683_s2] sm:$0xff]  ;;  %v378_v19 = vld [vmem:[%s686_s7 + $0x8] sm:$0xff]  ;;  %v149_v36 = vld [vmem:[%s687_s3 + $0x58] sm:$0xff] }
   0x8   :  { %114 = vmatpush.msra.mxu0 %v44_v5  ;;  %v333_v17 = vld [vmem:[%s685_s6] sm:$0xff]  ;;  %v39_v22 = vld [vmem:[%s684_s1 + $0x28] sm:$0xff]  ;;  %v140_v37 = vld [vmem:[%s687_s3 + $0x10] sm:$0xff] }
   0x9   :  { %v38_v21 = vld [vmem:[%s684_s1 + $0x20] sm:$0xff]  ;;  %v139_v34 = vld [vmem:[%s687_s3 + $0x8] sm:$0xff]  ;;  %v141_v39 = vld [vmem:[%s687_s3 + $0x18] sm:$0xff] }
   0xa   :  { %115 = vmatpush.msra.mxu0 %v43_v6  ;;  %v138_v31 = vld [vmem:[%s687_s3] sm:$0xff]  ;;  %v147_v35 = vld [vmem:[%s687_s3 + $0x48] sm:$0xff]  ;;  %v152_v42 = vld [vmem:[%s687_s3 + $0x70] sm:$0xff] }
   0xb   :  { %66 = vperm.xlu1 %445, %v50_v10   ;;  %v146_v32 = vld [vmem:[%s687_s3 + $0x40] sm:$0xff]  ;;  %v151_v40 = vld [vmem:[%s687_s3 + $0x68] sm:$0xff]  ;;  %v153_v44 = vld [vmem:[%s687_s3 + $0x78] sm:$0xff] }
   0xc   :  { %116 = vmatpush.msra.mxu0 %v42_v7  ;;  %76 = vperm.xlu0 %444, %v52_v14   ;;  %v150_v38 = vld [vmem:[%s687_s3 + $0x60] sm:$0xff]  ;;  %v143_v43 = vld [vmem:[%s687_s3 + $0x28] sm:$0xff]  ;;  %v144_v45 = vld [vmem:[%s687_s3 + $0x30] sm:$0xff]  ;;  %v14_v7 = vstv %s688_s8 }
   0xd   :  { %56 = vperm.xlu2 %446, %v48_v15   ;;  %v142_v41 = vld [vmem:[%s687_s3 + $0x20] sm:$0xff]  ;;  %v145_v46 = vld [vmem:[%s687_s3 + $0x38] sm:$0xff]  ;;  %v334_v6 = vld [vmem:[%s685_s6 + $0x8] sm:$0xff]  ;;  %15 = vst [vmem:[#allocation2] sm:$0x1] %v14_v7 }
   0xe   :  { %117 = vmatpush.msra.mxu0 %v41_v11  ;;  %v377_v8 = vld [vmem:[%s686_s7] sm:$0xff]  ;;  %v278_v15 = vld [vmem:[%s689_s4 + $0x8] sm:$0xff] }
  0x10   :  { %118 = vmatpush.msra.mxu0 %v40_v12 }
  0x11   :  { %413 = vmatmul.msk.f32.vlgmr.msra.gmra.mxu0 %vm84_vm0, %v34_v13  ;;  %v277_v13 = vld [vmem:[%s689_s4] sm:$0xff] }
  0x13   :  { %342 = vperm.xlu1 %445, %v334_v6  }
  0x14   :  { %337 = vperm.xlu0 %444, %v333_v17   ;;  %v400_v14 = vld [vmem:[#allocation2] sm:$0x1]  ;;  %v280_v17 = vld [vmem:[%s689_s4 + $0x18] sm:$0xff] }
  0x15   :  { %381 = vperm.xlu2 %446, %v377_v8  }
  0x19   :  { %414 = vmatmul.msk.f32.gmra.mxu0 %vm84_vm0, %v35_v16  ;;  %v279_v16 = vld [vmem:[%s689_s4 + $0x10] sm:$0xff] }
  0x1b   :  { %403 = vperm.xlu1 %445, %v400_v14  }
  0x1c   :  { %386 = vperm.xlu0 %444, %v378_v19  }
  0x21   :  { %415 = vmatmul.msk.f32.gmra.mxu0 %vm84_vm0, %v36_v18 }
  0x29   :  { %416 = vmatmul.msk.f32.gmra.mxu0 %vm84_vm0, %v37_v20 }
  0x31   :  { %417 = vmatmul.msk.f32.gmra.mxu0 %vm84_vm0, %v38_v21 }
  0x39   :  { %418 = vmatmul.msk.f32.gmra.mxu0 %vm84_vm0, %v39_v22 }
  0x5f   :  { %v62_v21 = vpop.permute.xlu2 %61 }
  0x75   :  { %v72_v20 = vpop.permute.xlu1 %71 }
  0x76   :  { %v82_v28 = vpop.permute.xlu0 %81 }
  0x7e   :  { %v77_v5 = vpop.permute.xlu0 %76 }
  0x8e   :  { %v570_v23 = vpop.f32.mrf.mxu0 }
  0x96   :  { %v572_v24 = vpop.f32.mrf.mxu0 }
  0x9e   :  { %v574_v25 = vpop.f32.mrf.mxu0 }
  0xa6   :  { %v576_v26 = vpop.f32.mrf.mxu0 }
  0xae   :  { %v578_v27 = vpop.f32.mrf.mxu0 }
  0xaf   :  { %v133_v9 = vadd.f32 %v578_v27, %v77_v5  ;;  %v67_v27 = vpop.permute.xlu1 %66 }
  0xb1   :  { %v276_v12 = vmul.f32 %v133_v9, %v133_v9 }
  0xb6   :  { %v135_v29 = vpop.f32.mrf.mxu0 }
  0xb7   :  { %v136_v30 = vadd.f32 %v135_v29, %v82_v28  ;;  %v127_v28 = vadd.f32 %v574_v25, %v67_v27  ;;  %v130_v29 = vadd.f32 %v576_v26, %v72_v20  ;;  %v331_v25 = vld [vmem:[%s690_s5] sm:$0xff]  ;;  %v338_v26 = vpop.permute.xlu0 %337 }
  0xb9   :  { %218 = vmatpush.msra.mxu1 %v136_v30  ;;  %441 = vmatpush.msra.mxu2 %v136_v30 }
  0xba   :  { %442 = vmatpush.msra.mxu3 %v136_v30  ;;  %419 = vmatmul.msk.f32.vlgmr.msra.gmra.mxu1 %vm154_vm1, %v138_v31  ;;  %v57_v30 = vpop.permute.xlu2 %56 }
  0xbb   :  { %427 = vmatmul.msk.f32.vlgmr.msra.gmra.mxu2 %vm154_vm1, %v146_v32  ;;  %429 = vmatmul.msk.f32.vlgmr.msra.gmra.mxu3 %vm154_vm1, %v148_v33  ;;  %v124_v32 = vadd.f32 %v572_v24, %v62_v21 }
  0xc2   :  { %420 = vmatmul.msk.f32.gmra.mxu1 %vm154_vm1, %v139_v34 }
  0xc3   :  { %428 = vmatmul.msk.f32.gmra.mxu2 %vm154_vm1, %v147_v35  ;;  %430 = vmatmul.msk.f32.gmra.mxu3 %vm154_vm1, %v149_v36  ;;  %v121_v35 = vadd.f32 %v570_v23, %v57_v30  ;;  %v332_v23 = vld [vmem:[%s690_s5 + $0x8] sm:$0xff] }
  0xca   :  { %421 = vmatmul.msk.f32.gmra.mxu1 %vm154_vm1, %v140_v37 }
  0xcb   :  { %431 = vmatmul.msk.f32.gmra.mxu3 %vm154_vm1, %v150_v38 }
  0xd2   :  { %422 = vmatmul.msk.f32.gmra.mxu1 %vm154_vm1, %v141_v39 }
  0xd3   :  { %432 = vmatmul.msk.f32.gmra.mxu3 %vm154_vm1, %v151_v40 }
  0xda   :  { %423 = vmatmul.msk.f32.gmra.mxu1 %vm154_vm1, %v142_v41 }
  0xdb   :  { %433 = vmatmul.msk.f32.gmra.mxu3 %vm154_vm1, %v152_v42 }
  0xe2   :  { %424 = vmatmul.msk.f32.gmra.mxu1 %vm154_vm1, %v143_v43 }
  0xe3   :  { %434 = vmatmul.msk.f32.gmra.mxu3 %vm154_vm1, %v153_v44  ;;  %v343_v44 = vpop.permute.xlu1 %342 }
  0xea   :  { %425 = vmatmul.msk.f32.gmra.mxu1 %vm154_vm1, %v144_v45 }
  0xf2   :  { %426 = vmatmul.msk.f32.gmra.mxu1 %vm154_vm1, %v145_v46 }
 0x137   :  { %v220_v47 = vpop.f32.mrf.mxu1 }
 0x13e   :  { %v250_v48 = vpop.f32.mrf.mxu3  ;;  %v244_v60 = vpop.f32.mrf.mxu2 }
 0x13f   :  { %v223_v49 = vpop.f32.mrf.mxu1  ;;  %v268_v11 = vmul.f32 %v244_v60, %v220_v47  ;;  %v382_v47 = vpop.permute.xlu2 %381 }
 0x146   :  { %v253_v50 = vpop.f32.mrf.mxu3  ;;  %v247_v3 = vpop.f32.mrf.mxu2 }
 0x147   :  { %v226_v51 = vpop.f32.mrf.mxu1  ;;  %v269_v10 = vmul.f32 %v247_v3, %v223_v49 }
 0x148   :  { %v270_v4 = vmul.f32 %v250_v48, %v226_v51 }
 0x14e   :  { %v256_v53 = vpop.f32.mrf.mxu3 }
 0x14f   :  { %v229_v52 = vpop.f32.mrf.mxu1 }
 0x150   :  { %v271_v2 = vmul.f32 %v253_v50, %v229_v52  ;;  %v387_v50 = vpop.permute.xlu0 %386 }
 0x156   :  { %v259_v55 = vpop.f32.mrf.mxu3 }
 0x157   :  { %v232_v54 = vpop.f32.mrf.mxu1 }
 0x158   :  { %v272_v1 = vmul.f32 %v256_v53, %v232_v54 }
 0x15e   :  { %v262_v57 = vpop.f32.mrf.mxu3 }
 0x15f   :  { %v235_v56 = vpop.f32.mrf.mxu1 }
 0x160   :  { %v273_v0 = vmul.f32 %v259_v55, %v235_v56 }
 0x166   :  { %v265_v59 = vpop.f32.mrf.mxu3 }
 0x167   :  { %v238_v58 = vpop.f32.mrf.mxu1 }
 0x168   :  { %v274_v63 = vmul.f32 %v262_v57, %v238_v58 }
 0x16f   :  { %v241_v61 = vpop.f32.mrf.mxu1 }
 0x170   :  { %v275_v62 = vmul.f32 %v265_v59, %v241_v61  ;;  %v404_v59 = vpop.permute.xlu1 %403 }
 0x171   :  { %v406_v61 = vperm.slane %v404_v59, 0 }
 0x172   :  { %301 = vmatpush.msrb.mxu2 %v275_v62 }
 0x174   :  { %302 = vmatpush.msrb.mxu2 %v274_v63 }
 0x176   :  { %303 = vmatpush.msrb.mxu2 %v273_v0 }
 0x178   :  { %304 = vmatpush.msrb.mxu2 %v272_v1 }
 0x17a   :  { %305 = vmatpush.msrb.mxu2 %v271_v2 }
 0x17c   :  { %306 = vmatpush.msrb.mxu2 %v270_v4 }
 0x17e   :  { %307 = vmatpush.msrb.mxu2 %v269_v10 }
 0x180   :  { %308 = vmatpush.msrb.mxu2 %v268_v11 }
 0x182   :  { %309 = vmatpush.msrb.mxu2 %v276_v12 }
 0x183   :  { %435 = vmatmul.msk.f32.vlgmr.msrb.gmra.mxu2 %vm281_vm2, %v277_v13 }
 0x18b   :  { %436 = vmatmul.msk.f32.gmra.mxu2 %vm281_vm2, %v278_v15 }
 0x193   :  { %437 = vmatmul.msk.f32.gmra.mxu2 %vm281_vm2, %v279_v16 }
 0x19b   :  { %438 = vmatmul.msk.f32.gmra.mxu2 %vm281_vm2, %v280_v17 }
 0x206   :  { %v311_v18 = vpop.f32.mrf.mxu2 }
 0x207   :  { %v323_v38 = vadd.f32 %v311_v18, %v121_v35 }
 0x209   :  { %v327_v41 = vmax.f32 %v323_v38, 0.0 }
 0x20e   :  { %v314_v19 = vpop.f32.mrf.mxu2 }
 0x20f   :  { %v324_v36 = vadd.f32 %v314_v19, %v124_v32 }
 0x211   :  { %v328_v40 = vmax.f32 %v324_v36, 0.0 }
 0x216   :  { %v317_v22 = vpop.f32.mrf.mxu2 }
 0x217   :  { %v325_v33 = vadd.f32 %v317_v22, %v127_v28 }
 0x219   :  { %v329_v39 = vmax.f32 %v325_v33, 0.0 }
 0x21e   :  { %v320_v31 = vpop.f32.mrf.mxu2 }
 0x21f   :  { %v326_v34 = vadd.f32 %v320_v31, %v130_v29 }
 0x221   :  { %v330_v37 = vmax.f32 %v326_v34, 0.0 }
 0x223   :  { %364 = vmatpush.msrb.mxu3 %v330_v37 }
 0x225   :  { %365 = vmatpush.msrb.mxu3 %v329_v39 }
 0x227   :  { %366 = vmatpush.msrb.mxu3 %v328_v40 }
 0x229   :  { %367 = vmatpush.msrb.mxu3 %v327_v41 }
 0x22a   :  { %439 = vmatmul.msk.f32.vlgmr.msrb.gmra.mxu3 %vm345_vm3, %v331_v25 }
 0x232   :  { %440 = vmatmul.msk.f32.gmra.mxu3 %vm345_vm3, %v332_v23 }
 0x2ad   :  { %v369_v24 = vpop.f32.mrf.mxu3 }
 0x2ae   :  { %v370_v42 = vadd.f32 %v369_v24, %v338_v26 }
 0x2b0   :  { %v375_v43 = vmax.f32 %v370_v42, 0.0 }
 0x2b2   :  { %v389_v48 = vmul.f32 %v382_v47, %v375_v43 }
 0x2b4   :  { %v391_v52 = vsel %vm154_vm1, %v389_v48, 0.0 }
 0x2b5   :  { %v372_v45 = vpop.f32.mrf.mxu3 }
 0x2b6   :  { %v373_v46 = vadd.f32 %v372_v45, %v343_v44 }
 0x2b8   :  { %v376_v49 = vmax.f32 %v373_v46, 0.0 }
 0x2ba   :  { %v390_v51 = vmul.f32 %v387_v50, %v376_v49 }
 0x2bc   :  { %v392_v53 = vsel %vm154_vm1, %v390_v51, 0.0 }
 0x2bd   :  { %v393_v54 = vadd.f32 %v392_v53, %v391_v52 }
 0x2bf   :  { %v394_v55 = vrot.slane %v393_v54, 4 }
 0x2c1   :  { %v395_v56 = vadd.f32 %v394_v55, %v393_v54 }
 0x2c3   :  { %v396_v57 = vrot.slane %v395_v56, 2 }
 0x2c5   :  { %v397_v58 = vadd.f32 %v396_v57, %v395_v56 }
 0x2c7   :  { %v398_v60 = vrot.slane %v397_v58, 1 }
 0x2c9   :  { %v399_v62 = vadd.f32 %v398_v60, %v397_v58 }
 0x2cb   :  { %v407_v63 = vadd.f32 %v406_v61, %v399_v62 }
 0x2cd   :  { %408 = vst.msk [vmem:[%s691_s9] sm:$0xff] %vm154_vm1, %v407_v63 }

</bundles_post_ra>
